<compile_context>
chip_gen: v7x
topology: tpu7x:2x2x1
jax: 0.10.0
libtpu: 0.0.40
codegen_flags: <defaults>
</compile_context>

<pallas_src>
import functools

import jax
import jax.numpy as jnp
from jax import lax
from jax.experimental import pallas as pl
from jax.experimental.pallas import tpu as pltpu


_SUBLANES = 8    # sublane replication of the propagated row vector (vreg granularity)
_LANES = 128     # node axis is padded to a multiple of the lane width


def _pad_to_lanes(n: int) -> int:
    return ((n + _LANES - 1) // _LANES) * _LANES


def _pick_block_rows(n_pad: int) -> int:
    # Row-block size for the streamed layer-0 DMA (contiguous HBM rows).
    for cand in (512, 256, 128):
        if n_pad % cand == 0:
            return cand
    return n_pad  # unreachable: n_pad is always a multiple of 128


def _lightgcn_kernel(m_hbm_ref, s0_ref, out_ref, m_vmem_ref, sem_ref, *,
                     num_layers, inv_denom, block_rows):
    """All message-passing layers + the layer/feature mean, collapsed to matvecs.

    m_hbm_ref : [Np, Np] bf16 (HBM)  src-major normalized adjacency, streamed in once
    s0_ref    : [8, Np]  f32 (VMEM)  sublane-replicated feature sums of H^0
    out_ref   : [8, Np]  f32 (VMEM)  sublane-replicated (sum_l s^l) / ((L+1)*D); row 0 used
    m_vmem_ref: [Np, Np] bf16 scratch -- M becomes fully VMEM-resident after layer 0
    sem_ref   : DMA semaphores, 2-deep in-flight window
    """
    n_pad = m_vmem_ref.shape[0]
    n_blocks = n_pad // block_rows

    def dma(b, slot):
        r = b * block_rows  # static Python int
        return pltpu.make_async_copy(
            m_hbm_ref.at[pl.ds(r, block_rows), :],
            m_vmem_ref.at[pl.ds(r, block_rows), :],
            sem_ref.at[slot],
        )

    # Prime up to two row-block DMAs (double-buffered in-flight window).
    dma(0, 0).start()
    if n_blocks > 1:
        dma(1, 1).start()

    s0 = s0_ref[...]                       # f32 [8, Np]
    s1 = jnp.zeros_like(s0)

    # Streamed layer 0: accumulate s0[:, blk] @ M[blk, :] as each row block lands,
    # overlapping the one-shot HBM->VMEM sweep of M with MXU compute.
    for b in range(n_blocks):              # static trip count -> fully unrolled
        slot = b % 2
        dma(b, slot).wait()
        if b + 2 < n_blocks:
            dma(b + 2, slot).start()       # slot's previous DMA just completed
        r = b * block_rows
        m_blk = m_vmem_ref[pl.ds(r, block_rows), :]          # [blk, Np] bf16
        s0_blk = s0[:, r:r + block_rows]                     # [8, blk]  f32
        s1 = s1 + jnp.dot(s0_blk.astype(jnp.bfloat16), m_blk,
                          preferred_element_type=jnp.float32)

    # Layers 1..L-1 reuse the now fully VMEM-resident M (single HBM read total).
    m = m_vmem_ref[...]

    def layer_body(_, carry):
        s, acc = carry
        s_new = jnp.dot(s.astype(jnp.bfloat16), m, preferred_element_type=jnp.float32)
        return s_new, acc + s_new

    s, acc = lax.fori_loop(0, num_layers - 1, layer_body, (s1, s0 + s1), unroll=True)
    out_ref[...] = (acc * inv_denom).astype(out_ref.dtype)


def normalize_adjacency(adj: jax.Array) -> jax.Array:
    """Src-major normalized message passing matrix M[u,v] = out_norm[u]*A[u,v]*in_norm[v]."""
    out_deg = jnp.maximum(adj.sum(axis=1), 1.0)   # out-degree of src nodes, clamp(min=1)
    in_deg = jnp.maximum(adj.sum(axis=0), 1.0)    # in-degree of dst nodes, clamp(min=1)
    return (out_deg ** -0.5)[:, None] * adj.astype(jnp.float32) * (in_deg ** -0.5)[None, :]


def prepare_normalized_adjacency(adj: jax.Array) -> jax.Array:
    """ONE-TIME preprocessing (hoisted out of the training hot path per the perf review):
    degree-normalize, cast to bf16, zero-pad to lane multiples."""
    n = adj.shape[0]
    n_pad = _pad_to_lanes(n)
    m = normalize_adjacency(adj)
    return jnp.pad(m.astype(jnp.bfloat16), ((0, n_pad - n), (0, n_pad - n)))


def _vmem_limit_bytes(resident_bytes: int) -> int:
    """Generation-aware VMEM request: capacity minus headroom, never the flat 64 MiB cap."""
    try:
        capacity = int(pltpu.get_tpu_info().vmem_capacity_bytes)
    except Exception:
        capacity = 64 << 20  # conservative fallback (v7x per-core size)
    cap = max(capacity - (8 << 20), 16 << 20)     # explicit headroom, predictable ceiling
    return int(min(max(resident_bytes, 32 << 20), cap))


def lightgcn_message_passing(m_padded_bf16: jax.Array, h0: jax.Array,
                             num_layers: int) -> jax.Array:
    """Returns total_embedding of shape [N] == torch.cat([H^0..H^L], dim=1).mean(1)."""
    n, d = h0.shape
    n_pad = m_padded_bf16.shape[0]

    # Exact algebraic collapse: the final mean only needs per-node feature sums.
    s0 = jnp.pad(h0.astype(jnp.float32).sum(axis=1), (0, n_pad - n))      # [Np]
    s0_rows = jnp.broadcast_to(s0[None, :], (_SUBLANES, n_pad))           # [8, Np] lane-dense

    if num_layers == 0:
        return s0[:n] / float(d)

    block_rows = _pick_block_rows(n_pad)

    m_bytes = n_pad * n_pad * 2                      # resident bf16 adjacency
    slab_bytes = _SUBLANES * n_pad * 4               # one [8, Np] f32 slab
    resident = m_bytes + 8 * slab_bytes + (4 << 20)  # slabs + Mosaic internal scratch slack
    vmem_limit = _vmem_limit_bytes(resident)

    cost = pl.CostEstimate(
        flops=2 * num_layers * _SUBLANES * n_pad * n_pad,
        transcendentals=0,
        bytes_accessed=m_bytes + 2 * slab_bytes,
    )

    kernel = functools.partial(
        _lightgcn_kernel,
        num_layers=num_layers,
        inv_denom=1.0 / float((num_layers + 1) * d),
        block_rows=block_rows,
    )
    out = pl.pallas_call(
        kernel,
        out_shape=jax.ShapeDtypeStruct((_SUBLANES, n_pad), jnp.float32),
        # No grid: the layer recurrence runs in-kernel. M stays in HBM (pl.ANY) and is
        # streamed exactly once into a full-size VMEM scratch, overlapped with layer-0.
        in_specs=[
            pl.BlockSpec(memory_space=pl.ANY),                   # M (bf16, HBM, manual DMA)
            pl.BlockSpec(memory_space=pltpu.MemorySpace.VMEM),   # s0 rows (f32)
        ],
        out_specs=pl.BlockSpec(memory_space=pltpu.MemorySpace.VMEM),
        scratch_shapes=[
            pltpu.VMEM((n_pad, n_pad), jnp.bfloat16),            # resident copy of M
            pltpu.SemaphoreType.DMA((2,)),                       # 2-deep DMA window
        ],
        compiler_params=pltpu.CompilerParams(vmem_limit_bytes=vmem_limit),
        cost_estimate=cost,
    )(m_padded_bf16, s0_rows)
    return out[0, :n]


@functools.partial(jax.jit, static_argnames=("num_layers",))
def lightgcn_forward(embedding_table, node_indices, m_padded_bf16,
                     user_ids, positive_item_ids, negative_item_ids, *, num_layers):
    # Embedding lookup (glue gather) -- corresponds to self.embedding_table(node_indices).
    h0 = embedding_table[node_indices]
    total_embedding = lightgcn_message_passing(m_padded_bf16, h0, num_layers)
    # TODO(synk): TripletModelOutput / BPR loss classes are not provided; return the
    # gathered per-node values (scalars, per the cat(...).mean(1) in the reference code).
    user_embedding = total_embedding[user_ids]
    positive_item_embedding = total_embedding[positive_item_ids]
    negative_item_embedding = total_embedding[negative_item_ids]
    return user_embedding, positive_item_embedding, negative_item_embedding, total_embedding


def _reference_message_passing(m_dst_src, h0, num_layers):
    """Pure-JAX f32 reference matching the DGL module semantics."""
    results = [h0.astype(jnp.float32)]
    h = h0.astype(jnp.float32)
    for _ in range(num_layers):
        h = m_dst_src @ h
        results.append(h)
    return jnp.concatenate(results, axis=1).mean(axis=1)


def _emulated_matvec_reference(m_src_dst, h0, num_layers):
    """Pure-JAX replica of the kernel's bf16/f32 mixed-precision math (structural check)."""
    d = h0.shape[1]
    m_bf16 = m_src_dst.astype(jnp.bfloat16)
    s = h0.astype(jnp.float32).sum(axis=1)[None, :]
    acc = s
    for _ in range(num_layers):
        s = jnp.dot(s.astype(jnp.bfloat16), m_bf16, preferred_element_type=jnp.float32)
        acc = acc + s
    return (acc / float((num_layers + 1) * d))[0]


if __name__ == "__main__":
    number_of_users = 16
    number_of_items = 48
    embedding_dim = 32
    num_layers = 3
    n_nodes = number_of_users + number_of_items

    key = jax.random.PRNGKey(0)
    k_emb, k_u, k_p, k_n = jax.random.split(key, 4)

    # Deterministic parameter init: uniform(-0.05, 0.05), shape [N_users+N_items, D].
    embedding_table = jax.random.uniform(
        k_emb, (n_nodes, embedding_dim), minval=-0.05, maxval=0.05, dtype=jnp.float32
    )

    # Deterministic bipartite graph (user <-> item, directed edges in both directions).
    src_list, dst_list = [], []
    for u in range(number_of_users):
        for k in range(5):
            item_node = number_of_users + ((u * 3 + k) % number_of_items)
            src_list += [u, item_node]
            dst_list += [item_node, u]
    adj = jnp.zeros((n_nodes, n_nodes), dtype=jnp.float32)          # adj[src, dst] = 1
    adj = adj.at[jnp.array(src_list), jnp.array(dst_list)].set(1.0)

    # One-time preprocessing, hoisted out of the per-step hot path (perf-review item 1).
    m_padded_bf16 = jax.block_until_ready(prepare_normalized_adjacency(adj))

    node_indices = jnp.arange(n_nodes, dtype=jnp.int32)
    user_ids = jax.random.randint(k_u, (4,), 0, number_of_users)
    positive_item_ids = number_of_users + jax.random.randint(k_p, (4,), 0, number_of_items)
    negative_item_ids = number_of_users + jax.random.randint(k_n, (4,), 0, number_of_items)

    u_e, p_e, n_e, total = lightgcn_forward(
        embedding_table, node_indices, m_padded_bf16,
        user_ids, positive_item_ids, negative_item_ids, num_layers=num_layers,
    )
    jax.block_until_ready((u_e, p_e, n_e, total))

    h0 = embedding_table[node_indices]
    m_src_dst = normalize_adjacency(adj)
    # Tight check: identical mixed-precision math as the kernel (structural correctness).
    emu_total = _emulated_matvec_reference(m_src_dst, h0, num_layers)
    assert jnp.allclose(total, emu_total, atol=1e-5, rtol=1e-4), "mismatch vs emulated reference"
    # Loose check: full-precision module semantics (bf16 adjacency introduces ~1% noise).
    ref_total = _reference_message_passing(m_src_dst.T, h0, num_layers)
    assert jnp.allclose(total, ref_total, rtol=5e-2, atol=1e-3), "mismatch vs f32 reference"

    print("KERNEL_OK")
</pallas_src>

<mosaic_0001>
module attributes {stable_mosaic.version = 11 : i64} {
  func.func @_lightgcn_kernel(%arg0: memref<128x128xbf16, #tpu.memory_space<any>>, %arg1: memref<8x128xf32, #tpu.memory_space<vmem>>, %arg2: memref<8x128xf32, #tpu.memory_space<vmem>>, %arg3: memref<128x128xbf16, #tpu.memory_space<vmem>>, %arg4: memref<2x!tpu.dma_semaphore, #tpu.memory_space<semaphore_mem>>) attributes {dimension_semantics = [], scalar_prefetch = 0 : i64, scratch_operands = 2 : i64, tpu.core_type = #tpu.core_type<tc>} {
    %c0_i32 = arith.constant 0 : i32
    %c0_i32_0 = arith.constant 0 : i32
    %c0_i32_1 = arith.constant 0 : i32
    %0 = tpu.memref_slice %arg0[%c0_i32_0, %c0_i32_1] : memref<128x128xbf16, #tpu.memory_space<any>> -> memref<128x128xbf16, #tpu.memory_space<any>>
    %c0_i32_2 = arith.constant 0 : i32
    %c0_i32_3 = arith.constant 0 : i32
    %1 = tpu.memref_slice %arg3[%c0_i32_2, %c0_i32_3] : memref<128x128xbf16, #tpu.memory_space<vmem>> -> memref<128x128xbf16, #tpu.memory_space<vmem>>
    %2 = tpu.memref_slice %arg4[%c0_i32] : memref<2x!tpu.dma_semaphore, #tpu.memory_space<semaphore_mem>> -> memref<1x!tpu.dma_semaphore, #tpu.memory_space<semaphore_mem>>
    %3 = tpu.memref_squeeze %2 : memref<1x!tpu.dma_semaphore, #tpu.memory_space<semaphore_mem>> -> memref<!tpu.dma_semaphore, #tpu.memory_space<semaphore_mem>>
    tpu.enqueue_dma source(%0 : memref<128x128xbf16, #tpu.memory_space<any>>) target(%1 : memref<128x128xbf16, #tpu.memory_space<vmem>>) target_semaphore(%3 : memref<!tpu.dma_semaphore, #tpu.memory_space<semaphore_mem>>)
    %c0 = arith.constant 0 : index
    %c0_4 = arith.constant 0 : index
    %4 = vector.load %arg1[%c0, %c0_4] : memref<8x128xf32, #tpu.memory_space<vmem>>, vector<8x128xf32>
    %cst = arith.constant 0.000000e+00 : f32
    %5 = vector.broadcast %cst : f32 to vector<8x128xf32>
    %c0_i32_5 = arith.constant 0 : i32
    %c0_i32_6 = arith.constant 0 : i32
    %c0_i32_7 = arith.constant 0 : i32
    %6 = tpu.memref_slice %arg0[%c0_i32_6, %c0_i32_7] : memref<128x128xbf16, #tpu.memory_space<any>> -> memref<128x128xbf16, #tpu.memory_space<any>>
    %c0_i32_8 = arith.constant 0 : i32
    %c0_i32_9 = arith.constant 0 : i32
    %7 = tpu.memref_slice %arg3[%c0_i32_8, %c0_i32_9] : memref<128x128xbf16, #tpu.memory_space<vmem>> -> memref<128x128xbf16, #tpu.memory_space<vmem>>
    %8 = tpu.memref_slice %arg4[%c0_i32_5] : memref<2x!tpu.dma_semaphore, #tpu.memory_space<semaphore_mem>> -> memref<1x!tpu.dma_semaphore, #tpu.memory_space<semaphore_mem>>
    %9 = tpu.memref_squeeze %8 : memref<1x!tpu.dma_semaphore, #tpu.memory_space<semaphore_mem>> -> memref<!tpu.dma_semaphore, #tpu.memory_space<semaphore_mem>>
    tpu.wait_dma2 semaphore(%9 : memref<!tpu.dma_semaphore, #tpu.memory_space<semaphore_mem>>) src(%6 : memref<128x128xbf16, #tpu.memory_space<any>>) dst(%7 : memref<128x128xbf16, #tpu.memory_space<vmem>>)
    %c0_10 = arith.constant 0 : index
    %c0_11 = arith.constant 0 : index
    %10 = vector.load %arg3[%c0_10, %c0_11] : memref<128x128xbf16, #tpu.memory_space<vmem>>, vector<128x128xbf16>
    %11 = arith.truncf %4 : vector<8x128xf32> to vector<8x128xbf16>
    %cst_12 = arith.constant dense<0.000000e+00> : vector<8x128xf32>
    %12 = tpu.matmul %11, %10, %cst_12 {dimension_numbers = #tpu.dot_dimension_numbers<[1], [0], [0], [1], [0, 0, 1, 1], [], []>} : vector<8x128xbf16>, vector<128x128xbf16>, vector<8x128xf32> -> vector<8x128xf32>
    %13 = arith.addf %5, %12 : vector<8x128xf32>
    %c0_13 = arith.constant 0 : index
    %c0_14 = arith.constant 0 : index
    %14 = vector.load %arg3[%c0_13, %c0_14] : memref<128x128xbf16, #tpu.memory_space<vmem>>, vector<128x128xbf16>
    %15 = arith.addf %4, %13 : vector<8x128xf32>
    %c0_i32_15 = arith.constant 0 : i32
    %16 = arith.truncf %13 : vector<8x128xf32> to vector<8x128xbf16>
    %cst_16 = arith.constant dense<0.000000e+00> : vector<8x128xf32>
    %17 = tpu.matmul %16, %14, %cst_16 {dimension_numbers = #tpu.dot_dimension_numbers<[1], [0], [0], [1], [0, 0, 1, 1], [], []>} : vector<8x128xbf16>, vector<128x128xbf16>, vector<8x128xf32> -> vector<8x128xf32>
    %18 = arith.addf %15, %17 : vector<8x128xf32>
    %c1_i32 = arith.constant 1 : i32
    %19 = arith.truncf %17 : vector<8x128xf32> to vector<8x128xbf16>
    %cst_17 = arith.constant dense<0.000000e+00> : vector<8x128xf32>
    %20 = tpu.matmul %19, %14, %cst_17 {dimension_numbers = #tpu.dot_dimension_numbers<[1], [0], [0], [1], [0, 0, 1, 1], [], []>} : vector<8x128xbf16>, vector<128x128xbf16>, vector<8x128xf32> -> vector<8x128xf32>
    %21 = arith.addf %18, %20 : vector<8x128xf32>
    %cst_18 = arith.constant 7.812500e-03 : f32
    %22 = vector.broadcast %cst_18 : f32 to vector<8x128xf32>
    %23 = arith.mulf %21, %22 : vector<8x128xf32>
    %c0_19 = arith.constant 0 : index
    %c0_20 = arith.constant 0 : index
    %24 = vector.load %arg2[%c0_19, %c0_20] : memref<8x128xf32, #tpu.memory_space<vmem>>, vector<8x128xf32>
    tpu.vector_store %arg2[%c0_19, %c0_20], %23 {strides = array<i32>} : memref<8x128xf32, #tpu.memory_space<vmem>>, vector<8x128xf32>,
    return
  }
}

</mosaic_0001>

<bundles_post_ra>
// kernel: lightgcn_forward.1
= control target key start
LH: loop header
LB: loop body
LE: loop exit
PB: predicated region body
PF: predicated region fallthrough
CT: control target
= control target key end

     0   :  { %s380_s0 = inlined_call_operand.vmem [shape: bf16[128,128], index: 0, kind: input, shape index: {}]   ;;  %s381_s1 = inlined_call_operand.vmem [shape: f32[8,128], index: 1, kind: input, shape index: {}]   ;;  %s382_s2 = inlined_call_operand.vmem [shape: f32[8,128], index: 2, kind: output, shape index: {}]  }
   0x1   :  { %v42_v0 = vld [vmem:[%s380_s0] sm:$0xff]  ;;  %v44_v1 = vld [vmem:[%s380_s0 + $0x8] sm:$0xff]  ;;  %v46_v2 = vld [vmem:[%s380_s0 + $0x10] sm:$0xff] }
   0x2   :  { %v48_v3 = vld [vmem:[%s380_s0 + $0x18] sm:$0xff]  ;;  %v50_v4 = vld [vmem:[%s380_s0 + $0x20] sm:$0xff]  ;;  %v52_v5 = vld [vmem:[%s380_s0 + $0x28] sm:$0xff] }
   0x3   :  { %v54_v6 = vld [vmem:[%s380_s0 + $0x30] sm:$0xff]  ;;  %v56_v7 = vld [vmem:[%s380_s0 + $0x38] sm:$0xff] }
   0x4   :  { %65 = vsyncadd [#allocation3], 1024  ;;  %v369_v8 = vld [vmem:[%s381_s1] sm:$0xff] }
   0x5   :  { %323 = dma.done.wait [#allocation3], 1024 }
   0x6   :  { %324 = vsyncadd [#allocation3], 4294966272  ;;  %v325_v9 = vmov 0.0   ;;  %vm326_vm0 = vmmov 0   ;;  %v79_v10 = vpack.c.bf16 %v369_v8, %v369_v8 }
   0x7   :  { %261 = vmatprep.subr.bf16.mxu0 %v325_v9  ;;  %277 = vmatprep.mubr.msk.bf16.mxu0 %vm326_vm0, %v325_v9 }
   0x8   :  { %262 = vmatpush3.bf16.msra.mxu0 %v42_v0  ;;  %281 = vmatprep.subr.bf16.mxu1 %v325_v9 }
   0x9   :  { %263 = vmatprep.subr.bf16.mxu0 %v325_v9  ;;  %282 = vmatpush3.bf16.msra.mxu1 %v42_v0 }
   0xa   :  { %283 = vmatprep.subr.bf16.mxu1 %v325_v9  ;;  %297 = vmatprep.mubr.msk.bf16.mxu1 %vm326_vm0, %v325_v9 }
   0xc   :  { %264 = vmatpush3.bf16.msra.mxu0 %v44_v1 }
   0xd   :  { %265 = vmatprep.subr.bf16.mxu0 %v325_v9  ;;  %284 = vmatpush3.bf16.msra.mxu1 %v44_v1 }
   0xe   :  { %285 = vmatprep.subr.bf16.mxu1 %v325_v9 }
  0x10   :  { %266 = vmatpush3.bf16.msra.mxu0 %v46_v2 }
  0x11   :  { %267 = vmatprep.subr.bf16.mxu0 %v325_v9  ;;  %286 = vmatpush3.bf16.msra.mxu1 %v46_v2 }
  0x12   :  { %287 = vmatprep.subr.bf16.mxu1 %v325_v9 }
  0x14   :  { %268 = vmatpush3.bf16.msra.mxu0 %v48_v3 }
  0x15   :  { %269 = vmatprep.subr.bf16.mxu0 %v325_v9  ;;  %288 = vmatpush3.bf16.msra.mxu1 %v48_v3 }
  0x16   :  { %289 = vmatprep.subr.bf16.mxu1 %v325_v9 }
  0x18   :  { %270 = vmatpush3.bf16.msra.mxu0 %v50_v4 }
  0x19   :  { %271 = vmatprep.subr.bf16.mxu0 %v325_v9  ;;  %290 = vmatpush3.bf16.msra.mxu1 %v50_v4 }
  0x1a   :  { %291 = vmatprep.subr.bf16.mxu1 %v325_v9 }
  0x1c   :  { %272 = vmatpush3.bf16.msra.mxu0 %v52_v5 }
  0x1d   :  { %273 = vmatprep.subr.bf16.mxu0 %v325_v9  ;;  %292 = vmatpush3.bf16.msra.mxu1 %v52_v5 }
  0x1e   :  { %293 = vmatprep.subr.bf16.mxu1 %v325_v9 }
  0x20   :  { %274 = vmatpush3.bf16.msra.mxu0 %v54_v6 }
  0x21   :  { %275 = vmatprep.subr.bf16.mxu0 %v325_v9  ;;  %294 = vmatpush3.bf16.msra.mxu1 %v54_v6 }
  0x22   :  { %295 = vmatprep.subr.bf16.mxu1 %v325_v9 }
  0x24   :  { %276 = vmatpush3.bf16.msra.mxu0 %v56_v7 }
  0x25   :  { %296 = vmatpush3.bf16.msra.mxu1 %v56_v7  ;;  %301 = vmatprep.subr.bf16.mxu0 %v325_v9 }
  0x27   :  { %278 = vmatmul.mubr.bf16.vlgmr.msra.gmra.mrb[0].mxu0 %v79_v10 }
  0x28   :  { %302 = vmatpush3.bf16.msra.mxu0 %v42_v0  ;;  %317 = vmatprep.mubr.msk.bf16.mxu0 %vm326_vm0, %v325_v9 }
  0x29   :  { %303 = vmatprep.subr.bf16.mxu0 %v325_v9 }
  0x2c   :  { %304 = vmatpush3.bf16.msra.mxu0 %v44_v1 }
  0x2d   :  { %305 = vmatprep.subr.bf16.mxu0 %v325_v9 }
  0x30   :  { %306 = vmatpush3.bf16.msra.mxu0 %v46_v2 }
  0x31   :  { %307 = vmatprep.subr.bf16.mxu0 %v325_v9 }
  0x34   :  { %308 = vmatpush3.bf16.msra.mxu0 %v48_v3 }
  0x35   :  { %309 = vmatprep.subr.bf16.mxu0 %v325_v9 }
  0x38   :  { %310 = vmatpush3.bf16.msra.mxu0 %v50_v4 }
  0x39   :  { %311 = vmatprep.subr.bf16.mxu0 %v325_v9 }
  0x3c   :  { %312 = vmatpush3.bf16.msra.mxu0 %v52_v5 }
  0x3d   :  { %313 = vmatprep.subr.bf16.mxu0 %v325_v9 }
  0x40   :  { %314 = vmatpush3.bf16.msra.mxu0 %v54_v6 }
  0x41   :  { %315 = vmatprep.subr.bf16.mxu0 %v325_v9 }
  0x44   :  { %316 = vmatpush3.bf16.msra.mxu0 %v56_v7 }
  0xfa   :  { %v114_v11 = vpop.f32.mrb[0].mxu0 }
  0xfb   :  { %v121_v12 = vpack.c.bf16 %v114_v11, %v114_v11  ;;  %v279_v13 = vpop.f32.mrb[1].mxu0  ;;  %v120_v16 = vadd.f32 %v114_v11, %v369_v8 }
  0xfc   :  { %v117_v14 = vpop.f32.mrb[2].mxu0 }
  0xfd   :  { %v280_v15 = vpop.f32.mrb[3].mxu0  ;;  %298 = vmatmul.mubr.bf16.vlgmr.msra.gmra.mrb[0].mxu1 %v121_v12 }
 0x1d0   :  { %v156_v17 = vpop.f32.mrb[0].mxu1 }
 0x1d1   :  { %v162_v18 = vadd.f32 %v156_v17, %v120_v16  ;;  %v163_v19 = vpack.c.bf16 %v156_v17, %v156_v17  ;;  %v299_v20 = vpop.f32.mrb[1].mxu1 }
 0x1d2   :  { %v159_v21 = vpop.f32.mrb[2].mxu1 }
 0x1d3   :  { %v300_v22 = vpop.f32.mrb[3].mxu1  ;;  %318 = vmatmul.mubr.bf16.vlgmr.msra.gmra.mrb[4].mxu0 %v163_v19 }
 0x2a6   :  { %v198_v23 = vpop.f32.mrb[4].mxu0 }
 0x2a7   :  { %v204_v24 = vadd.f32 %v198_v23, %v162_v18  ;;  %v319_v25 = vpop.f32.mrb[5].mxu0 }
 0x2a8   :  { %v201_v26 = vpop.f32.mrb[6].mxu0 }
 0x2a9   :  { %v205_v27 = vmul.f32 0.0078125, %v204_v24  ;;  %v320_v28 = vpop.f32.mrb[7].mxu0 }
 0x2ab   :  { %206 = vst [vmem:[%s382_s2] sm:$0xff] %v205_v27 }
 0x2ac   :  { %211 = vsyncmov [#allocation3] }
 0x2af   :  { %s212_s27 = vpop.sfrf %211 }
 0x2b0   :  { %p232_p0 = scmp.ne.s32.totalorder %s212_s27, 0 }
 0x2b2   :  { %216 = shalt.err (%p232_p0)  }
 0x2b3   :  { %218 = vsyncmov [#allocation3 + $0x1] }
 0x2b6   :  { %s219_s28 = vpop.sfrf %218 }
 0x2b7   :  { %p233_p1 = scmp.ne.s32.totalorder %s219_s28, 0 }
 0x2b9   :  { %223 = shalt.err (%p233_p1)  }

</bundles_post_ra>
